<compile_context>
chip_gen: v5e
topology: v5e:2x2
jax: 0.10.0
libtpu: 0.0.40
codegen_flags: <defaults>
</compile_context>

<pallas_src>
import math
from functools import partial

import jax
import jax.numpy as jnp
from jax.experimental import pallas as pl
from jax.experimental.pallas import tpu as pltpu


HIDDEN_DIM = 256
MID_DIM = 64
CATEGORY_NUM = 28


def _round_up(x, m):
    return (x + m - 1) // m * m


# --------------------------------------------------------------------------
# Fused kernel:  o = relu(x @ w1) @ w2     (one MXU->VPU->MXU chain per tile)
# --------------------------------------------------------------------------
def _classify_kernel(x_ref, w1_ref, w2_ref, o_ref):
    h = jnp.dot(x_ref[...], w1_ref[...], preferred_element_type=jnp.float32)
    h = jnp.maximum(h, 0.0)                                   # ReLU, stays in vregs
    o_ref[...] = jnp.dot(h, w2_ref[...],
                         preferred_element_type=jnp.float32).astype(o_ref.dtype)


def classify_forward(feature, w1T, w2T):
    """feature: (..., hidden_dim); w1T: (hidden_dim, 64); w2T: (64, category_num)."""
    orig_shape = feature.shape
    K = orig_shape[-1]
    x = feature.reshape(-1, K).astype(jnp.float32)
    M = x.shape[0]
    Hd = w1T.shape[1]
    C = w2T.shape[1]

    # Lane-dense output: pad category dim up to a multiple of 128 (unmasked vst).
    C_pad = _round_up(C, 128)
    if C_pad != C:
        w2p = jnp.zeros((Hd, C_pad), jnp.float32).at[:, :C].set(w2T.astype(jnp.float32))
    else:
        w2p = w2T.astype(jnp.float32)

    # M tiling: tile <= 256 rows, keep >= 2 grid steps when possible (v7x megacore).
    tm = 256
    if M < 2 * tm:
        tm = max(8, _round_up(pl.cdiv(M, 2), 8))
    M_pad = _round_up(M, tm)
    if M_pad != M:
        x = jnp.zeros((M_pad, K), jnp.float32).at[:M].set(x)

    out = pl.pallas_call(
        _classify_kernel,
        out_shape=jax.ShapeDtypeStruct((M_pad, C_pad), jnp.float32),
        grid_spec=pltpu.PrefetchScalarGridSpec(
            num_scalar_prefetch=0,
            grid=(M_pad // tm,),
            in_specs=[
                pl.BlockSpec((tm, K), lambda i: (i, 0)),      # x tile
                pl.BlockSpec((K, Hd), lambda i: (0, 0)),      # w1 resident
                pl.BlockSpec((Hd, C_pad), lambda i: (0, 0)),  # w2 resident (padded)
            ],
            out_specs=pl.BlockSpec((tm, C_pad), lambda i: (i, 0)),
        ),
        compiler_params=pltpu.CompilerParams(
            dimension_semantics=("parallel",),
            vmem_limit_bytes=32 * 1024 * 1024,
        ),
    )(x, w1T.astype(jnp.float32), w2p)

    return out[:M, :C].reshape(*orig_shape[:-1], C)


# --------------------------------------------------------------------------
# Parameter construction mirroring the torch __init__ (xavier_uniform, no bias).
# Weights are stored pre-transposed as (in, out) so the kernel computes x @ w.
# --------------------------------------------------------------------------
def init_classify_params(key, hidden_dim=HIDDEN_DIM, category_num=CATEGORY_NUM):
    k1, k2 = jax.random.split(key)
    b1 = math.sqrt(6.0 / (hidden_dim + MID_DIM))
    b2 = math.sqrt(6.0 / (MID_DIM + category_num))
    w1T = jax.random.uniform(k1, (hidden_dim, MID_DIM), jnp.float32, -b1, b1)
    w2T = jax.random.uniform(k2, (MID_DIM, category_num), jnp.float32, -b2, b2)
    return {"w1T": w1T, "w2T": w2T}


if __name__ == "__main__":
    key = jax.random.PRNGKey(0)
    kp, kx = jax.random.split(key)
    params = init_classify_params(kp)

    # Small shapes consistent with the module: (batch=2, segments=8, hidden=256)
    feature = jax.random.normal(kx, (2, 8, HIDDEN_DIM), jnp.float32)

    fwd = jax.jit(partial(classify_forward, w1T=params["w1T"], w2T=params["w2T"]))
    out = fwd(feature)
    jax.block_until_ready(out)

    # sanity check against a plain-JAX reference of the same math
    ref = jnp.maximum(feature.reshape(-1, HIDDEN_DIM) @ params["w1T"], 0.0) @ params["w2T"]
    ref = ref.reshape(2, 8, CATEGORY_NUM)
    assert out.shape == (2, 8, CATEGORY_NUM)
    assert bool(jnp.allclose(out, ref, rtol=2e-2, atol=2e-2))

    print("KERNEL_OK")
</pallas_src>

<mosaic_0001>
module attributes {stable_mosaic.version = 11 : i64} {
  func.func @_classify_kernel(%arg0: i32, %arg1: memref<8x256xf32, #tpu.memory_space<vmem>>, %arg2: memref<256x64xf32, #tpu.memory_space<vmem>>, %arg3: memref<64x128xf32, #tpu.memory_space<vmem>>, %arg4: memref<8x128xf32, #tpu.memory_space<vmem>>) attributes {dimension_semantics = [#tpu.dimension_semantics<parallel>], iteration_bounds = array<i64: 2>, scalar_prefetch = 0 : i64, scratch_operands = 0 : i64, tpu.core_type = #tpu.core_type<tc>, window_params = [{transform_indices = @transform_0, window_bounds = array<i64: 8, 256>}, {pipeline_mode = #tpu.pipeline_mode<synchronous>, transform_indices = @transform_1, window_bounds = array<i64: 256, 64>}, {pipeline_mode = #tpu.pipeline_mode<synchronous>, transform_indices = @transform_2, window_bounds = array<i64: 64, 128>}, {transform_indices = @transform_3, window_bounds = array<i64: 8, 128>}]} {
    %c0 = arith.constant 0 : index
    %c0_0 = arith.constant 0 : index
    %0 = vector.load %arg1[%c0, %c0_0] : memref<8x256xf32, #tpu.memory_space<vmem>>, vector<8x256xf32>
    %c0_1 = arith.constant 0 : index
    %c0_2 = arith.constant 0 : index
    %1 = vector.load %arg2[%c0_1, %c0_2] : memref<256x64xf32, #tpu.memory_space<vmem>>, vector<256x64xf32>
    %cst = arith.constant dense<0.000000e+00> : vector<8x64xf32>
    %2 = tpu.matmul %0, %1, %cst {dimension_numbers = #tpu.dot_dimension_numbers<[1], [0], [0], [1], [0, 0, 1, 1], [], []>} : vector<8x256xf32>, vector<256x64xf32>, vector<8x64xf32> -> vector<8x64xf32>
    %cst_3 = arith.constant 0.000000e+00 : f32
    %3 = vector.broadcast %cst_3 : f32 to vector<8x64xf32>
    %4 = arith.maximumf %2, %3 : vector<8x64xf32>
    %c0_4 = arith.constant 0 : index
    %c0_5 = arith.constant 0 : index
    %5 = vector.load %arg3[%c0_4, %c0_5] : memref<64x128xf32, #tpu.memory_space<vmem>>, vector<64x128xf32>
    %cst_6 = arith.constant dense<0.000000e+00> : vector<8x128xf32>
    %6 = tpu.matmul %4, %5, %cst_6 {dimension_numbers = #tpu.dot_dimension_numbers<[1], [0], [0], [1], [0, 0, 1, 1], [], []>} : vector<8x64xf32>, vector<64x128xf32>, vector<8x128xf32> -> vector<8x128xf32>
    %c0_7 = arith.constant 0 : index
    %c0_8 = arith.constant 0 : index
    %7 = vector.load %arg4[%c0_7, %c0_8] : memref<8x128xf32, #tpu.memory_space<vmem>>, vector<8x128xf32>
    tpu.vector_store %arg4[%c0_7, %c0_8], %6 {strides = array<i32>} : memref<8x128xf32, #tpu.memory_space<vmem>>, vector<8x128xf32>,
    return
  }
  func.func @transform_0(%arg0: i32) -> (i32, i32) {
    %c0_i32 = arith.constant 0 : i32
    %c0_i32_0 = arith.constant 0 : i32
    return %arg0, %c0_i32 : i32, i32
  }
  func.func @transform_1(%arg0: i32) -> (i32, i32) {
    %c0_i32 = arith.constant 0 : i32
    %c0_i32_0 = arith.constant 0 : i32
    %c0_i32_1 = arith.constant 0 : i32
    return %c0_i32, %c0_i32_0 : i32, i32
  }
  func.func @transform_2(%arg0: i32) -> (i32, i32) {
    %c0_i32 = arith.constant 0 : i32
    %c0_i32_0 = arith.constant 0 : i32
    %c0_i32_1 = arith.constant 0 : i32
    return %c0_i32, %c0_i32_0 : i32, i32
  }
  func.func @transform_3(%arg0: i32) -> (i32, i32) {
    %c0_i32 = arith.constant 0 : i32
    %c0_i32_0 = arith.constant 0 : i32
    return %arg0, %c0_i32 : i32, i32
  }
}

</mosaic_0001>

<bundles_post_ra>
// kernel: classify_forward.1
= control target key start
LH: loop header
LB: loop body
LE: loop exit
PB: predicated region body
PF: predicated region fallthrough
CT: control target
= control target key end

     0   :  { %8 = vsyncpa [#allocation3], 0  ;;  %s721_s0 = inlined_call_operand.hbm [shape: f32[16,256], index: 0, kind: input, shape index: {}]   ;;  %s722_s1 = inlined_call_operand.vmem [shape: f32[256,64], index: 1, kind: input, shape index: {}]   ;;  %s723_s2 = inlined_call_operand.vmem [shape: f32[64,128], index: 2, kind: input, shape index: {}]   ;;  %s724_s3 = inlined_call_operand.vmem [shape: f32[16,128], index: 3, kind: output, shape index: {}]  }
   0x1   :  { %10 = vsyncpa [#allocation3 + $0x1], 0  ;;  %s500_s12 = smov 0   ;;  %s502_s13 = smov 0  }
   0x2   :  { %s504_s14 = smov 0   ;;  %s506_s15 = smov 0  }
   0x3 LB: > { %s519_s16 = sadd.s32 4294967295, %s478_s15   ;;  %s522_s17 = sadd.s32 1, %s478_s15   ;;  %s478_s15 = sphi %s506_s15, %s731_s15   ;;  %s474_s14 = sphi %s504_s14, %s730_s14   ;;  %s470_s13 = sphi %s502_s13, %s729_s13   ;;  %s466_s12 = sphi %s500_s12, %s728_s12  }
   0x4   : > { %s20_s18 = ssub.s32 %s478_s15, %s522_s17  ;;  %s23_s19 = sadd.s32 1, %s474_s14 }
   0x5   : > { %p21_p0 = scmp.eq.s32.totalorder %s20_s18, 0  ;;  %p30_p1 = scmp.ne.s32.totalorder %s474_s14, %s470_s13 }
   0x6   : > { %p31_p2 = scmp.eq.s32.totalorder %s478_s15, 0  ;;  %p36_p3 = scmp.ne.s32.totalorder %s470_s13, %s466_s12 }
   0x7   : > { %s532_s20 = scalar_select %p21_p0, %s474_s14, %s23_s19  }
   0x8   : > { %p534_p4 = por %p31_p2, %p30_p1  ;;  %p37_p5 = scmp.eq.s32.totalorder %s519_s16, 0 }
   0x9   : > { %p381_p6 = scmp.lt.s32.totalorder %s478_s15, 2  ;;  %s134_s23 = sand.u32 1, %s474_s14  }
   0xa   : > { %p540_p7 = por %p37_p5, %p36_p3  ;;  %s365_s24 = sshll.u32 %s134_s23, 4 }
   0xb   : > { %s374_s25 = sshll.u32 %s478_s15, 4  ;;  %s138_s29 = scalar_lea.vmem [#allocation2], %s365_s24 }
   0xc   : > { %s143_s28 = scalar_lea.hbm %s721_s0, %s374_s25  ;;  %s147_s30 = sshll.u32 %s138_s29, 4  ;;  %s148_s30 = int_to_ptr.vmem [resolvable:$true] %s147_s30 }
   0xd   : > { %s145_s4 = sshll.u32 %s143_s28, 4  ;;  %p551_p8 = pnand %p381_p6, %p534_p4  ;;  %s146_s4 = int_to_ptr.hbm [resolvable:$true] %s145_s4 }
   0xe   : > { %p368_p9 = scmp.ge.s32.totalorder %s478_s15, 1  ;;  %p152_p10 = scmp.lt.s32.totalorder %s478_s15, 3 }
   0xf   : > { %s135_s6 = scalar_lea.sflag [#allocation3], %s134_s23  ;;  %s414_s7 = sshra.s32 %s146_s4, 4  ;;  %s415_s7 = int_to_ptr.hbm [resolvable:$true] %s414_s7 }
  0x10   : > { %s416_s8 = scalar_lea.hbm %s415_s7, 16  ;;  %p418_p12 = pneg %p551_p8 }
  0x11   : > { %p417_p11 = scmp.ne.s32.totalorder %s415_s7, %s416_s8  ;;  %s421_s11 = scalar_lea.hbm %s721_s0, 32 }
  0x12   : > { %p422_p1 = scmp.lt.s32.totalorder %s415_s7, %s721_s0  ;;  %p423_p2 = scmp.lt.s32.totalorder %s421_s11, %s416_s8 }
  0x13   : > { %p419_p13 = pnand %p418_p12, %p417_p11 }
  0x14   : > { %p424_p3 = por %p423_p2, %p422_p1 }
  0x15   : > { %p420_p0 = pneg %p419_p13 }
  0x17   : > { %p425_p4 = pnand %p424_p3, %p420_p0 }
  0x19   : > { %428 = shalt.err (!%p425_p4)
}
  0x1a   : > { %380 = dma.hbm_to_vmem [thread:$0]  (!%p551_p8), %s146_s4, 256, %s148_s30, %s135_s6  }
  0x1b   : > { %p153_p5 = pnand %p368_p9, %p152_p10 }
  0x1c   : > { %s158_s19 = sand.u32 (!%p153_p5), 1, %s470_s13  }
  0x1d   : > { %156 = sbr.rel (%p153_p5) target bundleno = 331 (0x14b), region = 32  ;;  %s572_s21 = sshll.u32 (!%p153_p5), %s158_s19, 4 }
  0x1e   : > { %s159_s23 = scalar_lea.sflag (!%p153_p5), [#allocation3], %s158_s19  ;;  %s162_s24 = scalar_lea.vmem (!%p153_p5), [#allocation2], %s572_s21 }
  0x22   : > { %461 = dma.done.wait (%p540_p7), %s159_s23, 256  }
  0x23   : > { %463 = vsyncadd (%p540_p7), %s159_s23, 4294967040  ;;  %v206_v0 = vld [vmem:[%s722_s1 + $0x78] sm:$0xff]  ;;  %v205_v2 = vld [vmem:[%s722_s1 + $0x70] sm:$0xff]  ;;  %vm272_vm0 = vcmask 523264   ;;  %p185_p6 = scmp.lt.s32.totalorder %s519_s16, 1 }
  0x24   : > { %v222_v1 = vld [vmem:[%s722_s1 + $0xf8] sm:$0xff]  ;;  %223 = vmatpush.msra.mxu0 %v206_v0  ;;  %v221_v3 = vld [vmem:[%s722_s1 + $0xf0] sm:$0xff]  ;;  %v204_v4 = vld [vmem:[%s722_s1 + $0x68] sm:$0xff] }
  0x25   : > { %243 = vmatpush.msra.mxu1 %v222_v1  ;;  %v220_v5 = vld [vmem:[%s722_s1 + $0xe8] sm:$0xff]  ;;  %v203_v6 = vld [vmem:[%s722_s1 + $0x60] sm:$0xff]  ;;  %v202_v8 = vld [vmem:[%s722_s1 + $0x58] sm:$0xff]  ;;  %s733_s16 = smov (!%p185_p6, %s519_s16), 1 }
  0x26   : > { %224 = vmatpush.msra.mxu0 %v205_v2  ;;  %v219_v7 = vld [vmem:[%s722_s1 + $0xe0] sm:$0xff]  ;;  %v218_v9 = vld [vmem:[%s722_s1 + $0xd8] sm:$0xff]  ;;  %v201_v10 = vld [vmem:[%s722_s1 + $0x50] sm:$0xff]  ;;  %s370_s21 = sshll.u32 %s733_s16, 3 }
  0x27   : > { %244 = vmatpush.msra.mxu1 %v221_v3  ;;  %v217_v11 = vld [vmem:[%s722_s1 + $0xd0] sm:$0xff]  ;;  %v200_v12 = vld [vmem:[%s722_s1 + $0x48] sm:$0xff]  ;;  %v271_v14 = vld [vmem:[%s723_s2 + $0x38] sm:$0xff]  ;;  %s188_s26 = scalar_lea.vmem %s724_s3, %s370_s21 }
  0x28   : > { %225 = vmatpush.msra.mxu0 %v204_v4  ;;  %v216_v13 = vld [vmem:[%s722_s1 + $0xc8] sm:$0xff]  ;;  %v270_v15 = vld [vmem:[%s723_s2 + $0x30] sm:$0xff]  ;;  %v199_v16 = vld [vmem:[%s722_s1 + $0x40] sm:$0xff]  ;;  %284 = vmatpush.msra.mxu2 %v271_v14 }
  0x29   : > { %245 = vmatpush.msra.mxu1 %v220_v5  ;;  %v215_v17 = vld [vmem:[%s722_s1 + $0xc0] sm:$0xff]  ;;  %v269_v18 = vld [vmem:[%s723_s2 + $0x28] sm:$0xff]  ;;  %v198_v19 = vld [vmem:[%s722_s1 + $0x38] sm:$0xff] }
  0x2a   : > { %226 = vmatpush.msra.mxu0 %v203_v6  ;;  %v214_v20 = vld [vmem:[%s722_s1 + $0xb8] sm:$0xff]  ;;  %285 = vmatpush.msra.mxu2 %v270_v15  ;;  %v268_v21 = vld [vmem:[%s723_s2 + $0x20] sm:$0xff]  ;;  %v197_v22 = vld [vmem:[%s722_s1 + $0x30] sm:$0xff] }
  0x2b   : > { %246 = vmatpush.msra.mxu1 %v219_v7  ;;  %v213_v23 = vld [vmem:[%s722_s1 + $0xb0] sm:$0xff]  ;;  %v267_v24 = vld [vmem:[%s723_s2 + $0x18] sm:$0xff]  ;;  %v196_v25 = vld [vmem:[%s722_s1 + $0x28] sm:$0xff] }
  0x2c   : > { %227 = vmatpush.msra.mxu0 %v202_v8  ;;  %286 = vmatpush.msra.mxu2 %v269_v18  ;;  %v212_v26 = vld [vmem:[%s722_s1 + $0xa8] sm:$0xff]  ;;  %v195_v27 = vld [vmem:[%s722_s1 + $0x20] sm:$0xff]  ;;  %v194_v29 = vld [vmem:[%s722_s1 + $0x18] sm:$0xff] }
  0x2d   : > { %247 = vmatpush.msra.mxu1 %v218_v9  ;;  %v211_v28 = vld [vmem:[%s722_s1 + $0xa0] sm:$0xff]  ;;  %v210_v30 = vld [vmem:[%s722_s1 + $0x98] sm:$0xff]  ;;  %v193_v31 = vld [vmem:[%s722_s1 + $0x10] sm:$0xff] }
  0x2e   : > { %228 = vmatpush.msra.mxu0 %v201_v10  ;;  %287 = vmatpush.msra.mxu2 %v268_v21  ;;  %v209_v32 = vld [vmem:[%s722_s1 + $0x90] sm:$0xff]  ;;  %v192_v33 = vld [vmem:[%s722_s1 + $0x8] sm:$0xff]  ;;  %v191_v35 = vld [vmem:[%s722_s1] sm:$0xff] }
  0x2f   : > { %248 = vmatpush.msra.mxu1 %v217_v11  ;;  %v208_v34 = vld [vmem:[%s722_s1 + $0x88] sm:$0xff]  ;;  %v207_v36 = vld [vmem:[%s722_s1 + $0x80] sm:$0xff]  ;;  %v266_v39 = vld [vmem:[%s723_s2 + $0x10] sm:$0xff] }
  0x30   : > { %229 = vmatpush.msra.mxu0 %v200_v12  ;;  %288 = vmatpush.msra.mxu2 %v267_v24  ;;  %v189_v37 = vld [vmem:[%s162_s24] sm:$0xff]  ;;  %v190_v38 = vld [vmem:[%s162_s24 + $0x8] sm:$0xff] }
  0x31   : > { %249 = vmatpush.msra.mxu1 %v216_v13  ;;  %v265_v40 = vld [vmem:[%s723_s2 + $0x8] sm:$0xff]  ;;  %v264_v41 = vld [vmem:[%s723_s2] sm:$0xff] }
  0x32   : > { %230 = vmatpush.msra.mxu0 %v199_v16  ;;  %289 = vmatpush.msra.mxu2 %v266_v39 }
  0x33   : > { %250 = vmatpush.msra.mxu1 %v215_v17 }
  0x34   : > { %231 = vmatpush.msra.mxu0 %v198_v19  ;;  %290 = vmatpush.msra.mxu2 %v265_v40 }
  0x35   : > { %251 = vmatpush.msra.mxu1 %v214_v20 }
  0x36   : > { %232 = vmatpush.msra.mxu0 %v197_v22  ;;  %291 = vmatpush.msra.mxu2 %v264_v41 }
  0x37   : > { %252 = vmatpush.msra.mxu1 %v213_v23 }
  0x38   : > { %233 = vmatpush.msra.mxu0 %v196_v25 }
  0x39   : > { %253 = vmatpush.msra.mxu1 %v212_v26 }
  0x3a   : > { %234 = vmatpush.msra.mxu0 %v195_v27 }
  0x3b   : > { %254 = vmatpush.msra.mxu1 %v211_v28 }
  0x3c   : > { %235 = vmatpush.msra.mxu0 %v194_v29 }
  0x3d   : > { %255 = vmatpush.msra.mxu1 %v210_v30 }
  0x3e   : > { %236 = vmatpush.msra.mxu0 %v193_v31 }
  0x3f   : > { %256 = vmatpush.msra.mxu1 %v209_v32 }
  0x40   : > { %237 = vmatpush.msra.mxu0 %v192_v33 }
  0x41   : > { %257 = vmatpush.msra.mxu1 %v208_v34 }
  0x42   : > { %238 = vmatpush.msra.mxu0 %v191_v35 }
  0x43   : > { %258 = vmatpush.msra.mxu1 %v207_v36  ;;  %239 = vmatmul.f32.vlgmr.msra.gmra.mxu0 %v189_v37 }
  0x44   : > { %259 = vmatmul.f32.vlgmr.msra.gmra.mxu1 %v190_v38 }
  0xc0   : > { %v240_v42 = vpop.f32.mrf.mxu0 }
  0xc1   : > { %v260_v43 = vpop.f32.mrf.mxu1 }
  0xc2   : > { %v261_v44 = vadd.f32 %v260_v43, %v240_v42 }
  0xc4   : > { %v263_v45 = vmax.f32 %v261_v44, 0.0 }
  0xc6   : > { %371 = vmatmul.msk.f32.vlgmr.msra.gmra.mxu2 %vm272_vm0, %v263_v45 }
 0x149   : > { %v293_v46 = vpop.f32.mrf.mxu2 }
 0x14a   : > { %296 = vst [vmem:[%s188_s26] sm:$0xff] %v293_v46 }
 0x14b PF: > { %p13_p7 = scmp.ge.s32.totalorder %s522_s17, 4   ;;  %s728_s12 = smov %s470_s13 }
 0x14c   : > { %s729_s13 = smov %s474_s14  ;;  %s730_s14 = smov %s532_s20 }
 0x14d   : > { %s731_s15 = smov %s522_s17  ;;  %15 = sbr.rel (!%p13_p7) target bundleno = 3 (0x3), region = 72 }
 0x152   :  { %316 = vsyncpa [#allocation3], 1 }
 0x153   :  { %318 = vsyncpa [#allocation3 + $0x1], 1 }

</bundles_post_ra>
